<compile_context>
chip_gen: v7x
topology: tpu7x:2x2x1
jax: 0.10.0
libtpu: 0.0.40
codegen_flags: <defaults>
</compile_context>

<pallas_src>
import jax
import jax.numpy as jnp
from jax.experimental import pallas as pl
from jax.experimental.pallas import tpu as pltpu

LANES = 128


def adv_embed_kernel(p_ref, x_ref, o_ref):
    # p_ref: SMEM f32[10] = [w1, b1, w2, b2, w3_0, w3_1, w3_2, b3_0, b3_1, b3_2]
    # x_ref: VMEM f32[TR, 128]   (particles along the 128 vreg lanes)
    # o_ref: VMEM [3, TR, 128]   (class-major, full-width lane-dense stores)
    w1 = p_ref[0]
    b1 = p_ref[1]
    w2 = p_ref[2]
    b2 = p_ref[3]

    x = x_ref[...]
    h = jnp.maximum(x * w1 + b1, 0.0)          # fc1 + relu
    h = jnp.maximum(h * w2 + b2, 0.0)          # fc2 + relu

    # fc3: one lane-dense slab per class (z_c = h * w3[c] + b3[c]).
    z0 = h * p_ref[4] + p_ref[7]
    z1 = h * p_ref[5] + p_ref[8]
    z2 = h * p_ref[6] + p_ref[9]

    # log_softmax over the 3 classes, direct shifted form (VALU-light and
    # cancellation-free): u_c = z_c - max, lse = log(exp(u0)+exp(u1)+exp(u2)).
    # The third exp lands on the EUP slot, which has slack on every generation;
    # the VALU slot is what binds on v7x.
    m = jnp.maximum(jnp.maximum(z0, z1), z2)
    u0 = z0 - m
    u1 = z1 - m
    u2 = z2 - m
    lse = jnp.log(jnp.exp(u0) + jnp.exp(u1) + jnp.exp(u2))

    o_ref[0, :, :] = (u0 - lse).astype(o_ref.dtype)
    o_ref[1, :, :] = (u1 - lse).astype(o_ref.dtype)
    o_ref[2, :, :] = (u2 - lse).astype(o_ref.dtype)


def _cdiv(a, b):
    return -(-a // b)


def _round_up(x, m):
    return ((x + m - 1) // m) * m


def _default_tile_rows():
    """Per-generation row-tile default (see perf notes in the header)."""
    try:
        kind = jax.devices()[0].device_kind.lower()
    except Exception:
        return 2048
    if "v5" in kind:      # v5e: 16 MiB scoped-VMEM default -> ~8 MiB double-buffered
        return 2048
    return 4096           # v6e / v7x: 32 MiB scoped default -> ~16 MiB double-buffered


def adversarial_particle_embedding(jets, params, *, tile_rows=None,
                                   class_major=False, out_dtype=jnp.float32):
    """jets: (N, 1) float32; params: dict of fc1/fc2/fc3 weights + biases.

    Returns (N, 3) log-probabilities (PyTorch convention) by default, or the
    kernel-native class-major (3, N) slab (no transpose pass) if class_major.
    """
    N, F = jets.shape
    assert F == 1

    if tile_rows is None:
        tile_rows = _default_tile_rows()

    # ---- lane-dense retiling: particles -> lanes --------------------------
    rows = _cdiv(N, LANES)                    # sublane rows needed
    rows8 = _round_up(max(rows, 1), 8)        # sublane granularity
    # >= 2 grid steps whenever possible so the "parallel" axis shards across
    # the two v7x TensorCores (harmless on single-TC v5e/v6e).
    min_tiles = 2 if rows8 >= 16 else 1
    n_tiles = max(min_tiles, _cdiv(rows8, tile_rows))
    tr = _round_up(_cdiv(rows8, n_tiles), 8)
    rows_pad = n_tiles * tr
    n_pad = rows_pad * LANES

    flat = jets.reshape(N).astype(jnp.float32)
    if n_pad == N:
        x = flat.reshape(rows_pad, LANES)     # metadata-only, no HBM pad copy
    else:
        x = jnp.pad(flat, (0, n_pad - N)).reshape(rows_pad, LANES)

    # ---- all 10 params as SMEM scalars ------------------------------------
    scalars = jnp.concatenate(
        [
            params["w1"].reshape(-1), params["b1"].reshape(-1),
            params["w2"].reshape(-1), params["b2"].reshape(-1),
            params["w3"].reshape(-1), params["b3"].reshape(-1),
        ]
    ).astype(jnp.float32)                     # f32[10]

    out_bytes = 3 * jnp.dtype(out_dtype).itemsize
    cost = pl.CostEstimate(
        flops=22 * n_pad,
        transcendentals=4 * n_pad,
        bytes_accessed=(4 + out_bytes) * n_pad,
    )

    out = pl.pallas_call(
        adv_embed_kernel,
        out_shape=jax.ShapeDtypeStruct((3, rows_pad, LANES), out_dtype),
        grid_spec=pltpu.PrefetchScalarGridSpec(
            num_scalar_prefetch=0,
            grid=(n_tiles,),
            in_specs=[
                pl.BlockSpec(memory_space=pltpu.MemorySpace.SMEM),   # params
                pl.BlockSpec((tr, LANES), lambda i: (i, 0)),         # jets tile
            ],
            out_specs=pl.BlockSpec((3, tr, LANES), lambda i: (0, i, 0)),
        ),
        compiler_params=pltpu.CompilerParams(
            dimension_semantics=("parallel",),
        ),
        cost_estimate=cost,
    )(scalars, x)

    logp = out.reshape(3, n_pad)              # metadata-only (contiguous)
    if n_pad != N:
        logp = logp[:, :N]
    if class_major:
        return logp                           # (3, N): skips the transpose pass
    return logp.T                             # PyTorch-conventional (N, 3)


def _init_params(key):
    """Deterministic synthetic init matching the module's parameter shapes.

    xavier_uniform with relu gain for the weights, default uniform bias for
    fc1/fc2, constant 1 for fc3 bias (as in the module's __init__).
    """
    k1, k2, k3, kb1, kb2 = jax.random.split(key, 5)
    gain = jnp.sqrt(2.0)  # relu gain
    b12 = gain * jnp.sqrt(6.0 / 2.0)   # fc1/fc2: fan_in=1, fan_out=1
    b3w = gain * jnp.sqrt(6.0 / 4.0)   # fc3: fan_in=1, fan_out=3
    return {
        "w1": jax.random.uniform(k1, (1, 1), minval=-b12, maxval=b12),
        "b1": jax.random.uniform(kb1, (1,), minval=-1.0, maxval=1.0),
        "w2": jax.random.uniform(k2, (1, 1), minval=-b12, maxval=b12),
        "b2": jax.random.uniform(kb2, (1,), minval=-1.0, maxval=1.0),
        "w3": jax.random.uniform(k3, (3, 1), minval=-b3w, maxval=b3w),
        "b3": jnp.ones((3,), jnp.float32),
    }


def _reference(jets, p):
    h = jnp.maximum(jets @ p["w1"].T + p["b1"], 0.0)
    h = jnp.maximum(h @ p["w2"].T + p["b2"], 0.0)
    z = h @ p["w3"].T + p["b3"]
    return jax.nn.log_softmax(z, axis=-1)


# TODO(synk): the module's `return_extras=True` branch references an undefined
# `extras` in the original PyTorch code, so only the plain forward is implemented.

if __name__ == "__main__":
    key = jax.random.PRNGKey(0)
    kp, kx = jax.random.split(key)
    params = _init_params(kp)

    N = 1000  # non-multiple of 128: exercises padding + lane-dense path
    jets = jax.random.normal(kx, (N, 1), dtype=jnp.float32)

    ref = _reference(jets, params)

    # Default (PyTorch-conventional) (N, 3) path.
    out = adversarial_particle_embedding(jets, params)
    out = jax.block_until_ready(out)
    assert out.shape == (N, 3)
    assert jnp.allclose(out, ref, atol=1e-5, rtol=1e-5)

    # Class-major (3, N) fast path (no final transpose pass).
    out_cm = adversarial_particle_embedding(jets, params, class_major=True)
    out_cm = jax.block_until_ready(out_cm)
    assert out_cm.shape == (3, N)
    assert jnp.allclose(out_cm, ref.T, atol=1e-5, rtol=1e-5)

    print("KERNEL_OK")
</pallas_src>

<mosaic_0001>
module attributes {stable_mosaic.version = 11 : i64} {
  func.func @adv_embed_kernel(%arg0: i32, %arg1: memref<10xf32, #tpu.memory_space<smem>>, %arg2: memref<8x128xf32, #tpu.memory_space<vmem>>, %arg3: memref<3x8x128xf32, #tpu.memory_space<vmem>>) attributes {dimension_semantics = [#tpu.dimension_semantics<parallel>], iteration_bounds = array<i64: 1>, scalar_prefetch = 0 : i64, scratch_operands = 0 : i64, tpu.core_type = #tpu.core_type<tc>, window_params = [{transform_indices = @transform_0, window_bounds = array<i64: 10>}, {transform_indices = @transform_1, window_bounds = array<i64: 8, 128>}, {transform_indices = @transform_2, window_bounds = array<i64: 3, 8, 128>}]} {
    %c0 = arith.constant 0 : index
    %0 = memref.load %arg1[%c0] : memref<10xf32, #tpu.memory_space<smem>>
    %c1 = arith.constant 1 : index
    %1 = memref.load %arg1[%c1] : memref<10xf32, #tpu.memory_space<smem>>
    %c2 = arith.constant 2 : index
    %2 = memref.load %arg1[%c2] : memref<10xf32, #tpu.memory_space<smem>>
    %c3 = arith.constant 3 : index
    %3 = memref.load %arg1[%c3] : memref<10xf32, #tpu.memory_space<smem>>
    %c0_0 = arith.constant 0 : index
    %c0_1 = arith.constant 0 : index
    %4 = vector.load %arg2[%c0_0, %c0_1] : memref<8x128xf32, #tpu.memory_space<vmem>>, vector<8x128xf32>
    %5 = vector.broadcast %0 : f32 to vector<8x128xf32>
    %6 = arith.mulf %4, %5 : vector<8x128xf32>
    %7 = vector.broadcast %1 : f32 to vector<8x128xf32>
    %8 = arith.addf %6, %7 : vector<8x128xf32>
    %cst = arith.constant 0.000000e+00 : f32
    %9 = vector.broadcast %cst : f32 to vector<8x128xf32>
    %10 = arith.maximumf %8, %9 : vector<8x128xf32>
    %11 = vector.broadcast %2 : f32 to vector<8x128xf32>
    %12 = arith.mulf %10, %11 : vector<8x128xf32>
    %13 = vector.broadcast %3 : f32 to vector<8x128xf32>
    %14 = arith.addf %12, %13 : vector<8x128xf32>
    %cst_2 = arith.constant 0.000000e+00 : f32
    %15 = vector.broadcast %cst_2 : f32 to vector<8x128xf32>
    %16 = arith.maximumf %14, %15 : vector<8x128xf32>
    %c4 = arith.constant 4 : index
    %17 = memref.load %arg1[%c4] : memref<10xf32, #tpu.memory_space<smem>>
    %18 = vector.broadcast %17 : f32 to vector<8x128xf32>
    %19 = arith.mulf %16, %18 : vector<8x128xf32>
    %c7 = arith.constant 7 : index
    %20 = memref.load %arg1[%c7] : memref<10xf32, #tpu.memory_space<smem>>
    %21 = vector.broadcast %20 : f32 to vector<8x128xf32>
    %22 = arith.addf %19, %21 : vector<8x128xf32>
    %c5 = arith.constant 5 : index
    %23 = memref.load %arg1[%c5] : memref<10xf32, #tpu.memory_space<smem>>
    %24 = vector.broadcast %23 : f32 to vector<8x128xf32>
    %25 = arith.mulf %16, %24 : vector<8x128xf32>
    %c8 = arith.constant 8 : index
    %26 = memref.load %arg1[%c8] : memref<10xf32, #tpu.memory_space<smem>>
    %27 = vector.broadcast %26 : f32 to vector<8x128xf32>
    %28 = arith.addf %25, %27 : vector<8x128xf32>
    %c6 = arith.constant 6 : index
    %29 = memref.load %arg1[%c6] : memref<10xf32, #tpu.memory_space<smem>>
    %30 = vector.broadcast %29 : f32 to vector<8x128xf32>
    %31 = arith.mulf %16, %30 : vector<8x128xf32>
    %c9 = arith.constant 9 : index
    %32 = memref.load %arg1[%c9] : memref<10xf32, #tpu.memory_space<smem>>
    %33 = vector.broadcast %32 : f32 to vector<8x128xf32>
    %34 = arith.addf %31, %33 : vector<8x128xf32>
    %35 = arith.maximumf %22, %28 : vector<8x128xf32>
    %36 = arith.maximumf %35, %34 : vector<8x128xf32>
    %37 = arith.subf %22, %36 : vector<8x128xf32>
    %38 = arith.subf %28, %36 : vector<8x128xf32>
    %39 = arith.subf %34, %36 : vector<8x128xf32>
    %40 = math.exp %37 : vector<8x128xf32>
    %41 = math.exp %38 : vector<8x128xf32>
    %42 = arith.addf %40, %41 : vector<8x128xf32>
    %43 = math.exp %39 : vector<8x128xf32>
    %44 = arith.addf %42, %43 : vector<8x128xf32>
    %45 = math.log %44 : vector<8x128xf32>
    %46 = arith.subf %37, %45 : vector<8x128xf32>
    %c0_3 = arith.constant 0 : index
    %c0_4 = arith.constant 0 : index
    %c0_5 = arith.constant 0 : index
    %47 = vector.load %arg3[%c0_3, %c0_4, %c0_5] : memref<3x8x128xf32, #tpu.memory_space<vmem>>, vector<1x8x128xf32>
    %48 = vector.shape_cast %47 : vector<1x8x128xf32> to vector<8x128xf32>
    %49 = vector.shape_cast %46 : vector<8x128xf32> to vector<1x8x128xf32>
    tpu.vector_store %arg3[%c0_3, %c0_4, %c0_5], %49 {strides = array<i32>} : memref<3x8x128xf32, #tpu.memory_space<vmem>>, vector<1x8x128xf32>,
    %50 = arith.subf %38, %45 : vector<8x128xf32>
    %c1_6 = arith.constant 1 : index
    %c0_7 = arith.constant 0 : index
    %c0_8 = arith.constant 0 : index
    %51 = vector.load %arg3[%c1_6, %c0_7, %c0_8] : memref<3x8x128xf32, #tpu.memory_space<vmem>>, vector<1x8x128xf32>
    %52 = vector.shape_cast %51 : vector<1x8x128xf32> to vector<8x128xf32>
    %53 = vector.shape_cast %50 : vector<8x128xf32> to vector<1x8x128xf32>
    tpu.vector_store %arg3[%c1_6, %c0_7, %c0_8], %53 {strides = array<i32>} : memref<3x8x128xf32, #tpu.memory_space<vmem>>, vector<1x8x128xf32>,
    %54 = arith.subf %39, %45 : vector<8x128xf32>
    %c2_9 = arith.constant 2 : index
    %c0_10 = arith.constant 0 : index
    %c0_11 = arith.constant 0 : index
    %55 = vector.load %arg3[%c2_9, %c0_10, %c0_11] : memref<3x8x128xf32, #tpu.memory_space<vmem>>, vector<1x8x128xf32>
    %56 = vector.shape_cast %55 : vector<1x8x128xf32> to vector<8x128xf32>
    %57 = vector.shape_cast %54 : vector<8x128xf32> to vector<1x8x128xf32>
    tpu.vector_store %arg3[%c2_9, %c0_10, %c0_11], %57 {strides = array<i32>} : memref<3x8x128xf32, #tpu.memory_space<vmem>>, vector<1x8x128xf32>,
    return
  }
  func.func @transform_0(%arg0: i32) -> i32 {
    %c0_i32 = arith.constant 0 : i32
    %c0_i32_0 = arith.constant 0 : i32
    return %c0_i32 : i32
  }
  func.func @transform_1(%arg0: i32) -> (i32, i32) {
    %c0_i32 = arith.constant 0 : i32
    %c0_i32_0 = arith.constant 0 : i32
    return %arg0, %c0_i32 : i32, i32
  }
  func.func @transform_2(%arg0: i32) -> (i32, i32, i32) {
    %c0_i32 = arith.constant 0 : i32
    %c0_i32_0 = arith.constant 0 : i32
    %c0_i32_1 = arith.constant 0 : i32
    return %c0_i32, %arg0, %c0_i32_0 : i32, i32, i32
  }
}

</mosaic_0001>

<bundles_post_ra>
// kernel: tpu_custom_call.1
= control target key start
LH: loop header
LB: loop body
LE: loop exit
PB: predicated region body
PF: predicated region fallthrough
CT: control target
= control target key end

     0   :  { %7 = vsyncpa [#allocation5], 0  ;;  %s247_s0 = inlined_call_operand.hbm [shape: f32[10], index: 0, kind: input, shape index: {}]   ;;  %s248_s1 = inlined_call_operand.hbm [shape: f32[8,128], index: 1, kind: input, shape index: {}]   ;;  %s249_s2 = inlined_call_operand.hbm [shape: f32[3,8,128], index: 2, kind: output, shape index: {}]  }
   0x1   :  { %8 = vsyncpa [#allocation3], 0 }
   0x2   :  { %9 = vsyncpa [#allocation4], 0  ;;  %s131_s11 = scalar_lea.hbm %s247_s0, 16 }
   0x3   :  { %p132_p0 = scmp.ne.s32.totalorder %s247_s0, %s131_s11  ;;  %p135_p1 = scmp.lt.u32.totalorder %s131_s11, %s247_s0 }
   0x5   :  { %p137_p2 = pnand %p135_p1, %p132_p0 }
   0x7   :  { %140 = shalt.err (!%p137_p2)
}
   0x8   :  { %s191_s16 = smov [#allocation2]   ;;  %s192_s19 = smov [#allocation6]  }
   0x9   :  { %17 = dma.hbm_to_smem %s247_s0, 16, %s191_s16, [#allocation5]  }
   0xa   :  { %s24_s20 = sshll.u32 %s192_s19, 4  ;;  %s141_s23 = scalar_lea.hbm %s248_s1, 128  ;;  %s25_s20 = int_to_ptr.vmem [resolvable:$true] %s24_s20 }
   0xb   :  { %p142_p3 = scmp.ne.s32.totalorder %s248_s1, %s141_s23  ;;  %p145_p4 = scmp.lt.u32.totalorder %s141_s23, %s248_s1 }
   0xd   :  { %p147_p5 = pnand %p145_p4, %p142_p3 }
   0xf   :  { %150 = shalt.err (!%p147_p5)
}
  0x10   :  { %s151_s28 = scalar_lea.vmem %s25_s20, 128  ;;  %p156_p7 = scmp.lt.s32.totalorder %s25_s20, %s25_s20 }
  0x11   :  { %p152_p6 = scmp.ne.s32.totalorder %s25_s20, %s151_s28  ;;  %p157_p8 = scmp.lt.s32.totalorder %s151_s28, %s151_s28 }
  0x13   :  { %p158_p9 = por %p157_p8, %p156_p7 }
  0x15   :  { %p159_p10 = pnand %p158_p9, %p152_p6 }
  0x17   :  { %162 = shalt.err (!%p159_p10)
}
  0x18   :  { %27 = dma.hbm_to_vmem [thread:$0]  %s248_s1, 128, %s25_s20, [#allocation3]  }
  0x19   :  { %185 = dma.done.wait [#allocation5], 16  }
  0x1a   :  { %186 = vsyncadd [#allocation5], 4294967280 }
  0x1b   :  { %187 = dma.done.wait [#allocation3], 128  }
  0x1c   :  { %188 = vsyncadd [#allocation3], 4294967168 }
  0x1d   :  { %34 = sfence }
  0x1e   :  { %s35_s30 = sld [smem:[#allocation2]]  ;;  %s109_s3 = sld [smem:[#allocation2 + $0x1]]  ;;  %v39_v0 = vld [vmem:[#allocation6] sm:$0xff] }
  0x1f   :  { %s110_s4 = sld [smem:[#allocation2 + $0x2]]  ;;  %s111_s5 = sld [smem:[#allocation2 + $0x3]] }
  0x20   :  { %s112_s6 = sld [smem:[#allocation2 + $0x4]]  ;;  %s114_s7 = sld [smem:[#allocation2 + $0x5]] }
  0x21   :  { %s116_s8 = sld [smem:[#allocation2 + $0x6]]  ;;  %s113_s9 = sld [smem:[#allocation2 + $0x7]] }
  0x22   :  { %s115_s1 = sld [smem:[#allocation2 + $0x8]]  ;;  %s117_s10 = sld [smem:[#allocation2 + $0x9]] }
  0x23   :  { %s193_s11 = smov [#allocation7]  }
  0x24   :  { %v40_v1 = vstv %s35_s30  ;;  %v42_v2 = vstv %s109_s3  ;;  %s96_s12 = sshll.u32 %s193_s11, 4  ;;  %s97_s12 = int_to_ptr.vmem [resolvable:$true] %s96_s12 }
  0x25   :  { %v41_v3 = vmul.f32 %v40_v1, %v39_v0  ;;  %v45_v5 = vstv %s110_s4  ;;  %v47_v7 = vstv %s111_s5  ;;  %s163_s13 = scalar_lea.vmem %s97_s12, 384  ;;  %p168_p12 = scmp.lt.s32.totalorder %s97_s12, %s97_s12 }
  0x26   :  { %v51_v10 = vstv %s112_s6  ;;  %v57_v11 = vstv %s114_s7  ;;  %p164_p11 = scmp.ne.s32.totalorder %s97_s12, %s163_s13  ;;  %p169_p13 = scmp.lt.s32.totalorder %s163_s13, %s163_s13 }
  0x27   :  { %v43_v4 = vadd.f32 %v42_v2, %v41_v3  ;;  %v63_v12 = vstv %s116_s8  ;;  %v54_v14 = vstv %s113_s9 }
  0x28   :  { %v60_v15 = vstv %s115_s1  ;;  %v66_v16 = vstv %s117_s10  ;;  %p170_p0 = por %p169_p13, %p168_p12 }
  0x29   :  { %v44_v6 = vmax.f32 %v43_v4, 0.0 }
  0x2a   :  { %p171_p1 = pnand %p170_p0, %p164_p11 }
  0x2b   :  { %v46_v8 = vmul.f32 %v45_v5, %v44_v6 }
  0x2d   :  { %v48_v9 = vadd.f32 %v47_v7, %v46_v8 }
  0x2f   :  { %v49_v13 = vmax.f32 %v48_v9, 0.0 }
  0x31   :  { %v52_v17 = vmul.f32 %v51_v10, %v49_v13  ;;  %v58_v18 = vmul.f32 %v57_v11, %v49_v13  ;;  %v64_v19 = vmul.f32 %v63_v12, %v49_v13 }
  0x33   :  { %v55_v20 = vadd.f32 %v54_v14, %v52_v17  ;;  %v61_v21 = vadd.f32 %v60_v15, %v58_v18  ;;  %v67_v22 = vadd.f32 %v66_v16, %v64_v19 }
  0x35   :  { %v68_v23 = vmax.f32 %v55_v20, %v61_v21 }
  0x37   :  { %v69_v24 = vmax.f32 %v68_v23, %v67_v22 }
  0x39   :  { %v70_v25 = vsub.f32 %v55_v20, %v69_v24  ;;  %v71_v26 = vsub.f32 %v61_v21, %v69_v24  ;;  %v72_v27 = vsub.f32 %v67_v22, %v69_v24 }
  0x3b   :  { %v73_v28 = vmul.f32 1.442695, %v70_v25  ;;  %v75_v29 = vmul.f32 1.442695, %v71_v26  ;;  %v78_v30 = vmul.f32 1.442695, %v72_v27 }
  0x3d   :  { %123 = vpow2.f32 %v73_v28 }
  0x3e   :  { %125 = vpow2.f32 %v75_v29 }
  0x3f   :  { %127 = vpow2.f32 %v78_v30 }
  0x47   :  { %v124_v31 = vpop.eup %123 }
  0x48   :  { %v126_v32 = vpop.eup %125 }
  0x49   :  { %v128_v33 = vpop.eup %127  ;;  %v77_v34 = vadd.f32 %v126_v32, %v124_v31 }
  0x4b   :  { %v80_v35 = vadd.f32 %v128_v33, %v77_v34 }
  0x4d   :  { %129 = vlog2.f32 %v80_v35 }
  0x57   :  { %v130_v36 = vpop.eup %129 }
  0x58   :  { %v82_v37 = vmul.f32 0.6931472, %v130_v36 }
  0x5a   :  { %v83_v38 = vsub.f32 %v70_v25, %v82_v37  ;;  %v85_v39 = vsub.f32 %v71_v26, %v82_v37  ;;  %v88_v40 = vsub.f32 %v72_v27, %v82_v37 }
  0x5c   :  { %84 = vst [vmem:[#allocation7] sm:$0xff] %v83_v38  ;;  %87 = vst [vmem:[#allocation7 + $0x8] sm:$0xff] %v85_v39 }
  0x5d   :  { %90 = vst [vmem:[#allocation7 + $0x10] sm:$0xff] %v88_v40 }
  0x5e   :  { %174 = shalt.err (!%p171_p1)
}
  0x5f   :  { %s175_s16 = scalar_lea.hbm %s249_s2, 384 }
  0x60   :  { %p176_p2 = scmp.ne.s32.totalorder %s249_s2, %s175_s16  ;;  %p179_p3 = scmp.lt.u32.totalorder %s175_s16, %s249_s2 }
  0x62   :  { %p181_p4 = pnand %p179_p3, %p176_p2 }
  0x64   :  { %184 = shalt.err (!%p181_p4)
}
  0x65   :  { %s194_s21 = smov 128   ;;  %s195_s22 = smov 8  }
  0x66   :  { %102 = dma.vmem_to_hbm [thread:$0]  %s97_s12, 384, %s249_s2, [#allocation4], %s194_s21, %s194_s21, %s195_s22  }
  0x67   :  { %189 = dma.done.wait [#allocation4], 384  }
  0x68   :  { %190 = vsyncadd [#allocation4], 4294966912 }
  0x69   :  { %106 = vsyncpa [#allocation3], 1 }
  0x6a   :  { %107 = vsyncpa [#allocation4], 1 }
  0x6b   :  { %108 = vsyncpa [#allocation5], 1 }

</bundles_post_ra>
